<compile_context>
chip_gen: v5e
topology: v5e:2x2
jax: 0.10.0
libtpu: 0.0.40
codegen_flags: <defaults>
</compile_context>

<pallas_src>
import functools

import numpy as np
import jax
import jax.numpy as jnp
from jax.experimental import pallas as pl
from jax.experimental.pallas import tpu as pltpu

# ---- model geometry (implied by fc = Linear(10*23, 1)) ---------------------
L_IN = 53                       # conv1: (53-5)//2+1 = 25 ; conv2: 25-3+1 = 23
C1_OUT, K1, S1 = 20, 5, 2
C2_OUT, K2 = 10, 3
L1 = (L_IN - K1) // S1 + 1      # 25
L2 = L1 - K2 + 1                # 23
FC_IN = C2_OUT * L2             # 230

# hardware-aligned (8,128) padded feature sizes
L_IN_P = 64                     # 53  -> 64
H1_P = 512                      # 500 -> 512
H2_P = 256                      # 230 -> 256 (lane 230 is the constant-1 "bias lane")


def _round_up(x, m):
    return (x + m - 1) // m * m


def _cdiv(a, b):
    return -(-a // b)


# ---- one-time glue: exact conv -> Toeplitz matmul weights (cached) ---------
def prepare_params(params):
    """Build padded, MXU-ready weights once at parameter-load time."""
    # guard the constant-1 bias-lane trick (fragile if geometry ever changes)
    assert FC_IN < H2_P, "bias lane would collide with real fc inputs"
    assert C1_OUT * L1 <= H1_P and C2_OUT * L2 <= H2_P

    w1 = np.asarray(params["w1"], np.float32)    # (20, 1, 5)
    b1 = np.asarray(params["b1"], np.float32)    # (20,)
    w2 = np.asarray(params["w2"], np.float32)    # (10, 20, 3)
    b2 = np.asarray(params["b2"], np.float32)    # (10,)
    wfc = np.asarray(params["wfc"], np.float32)  # (1, 230)
    bfc = np.asarray(params["bfc"], np.float32)  # (1,)

    # conv1 -> A1[S1*t+k, c*L1+t] = w1[c, 0, k]
    a1 = np.zeros((L_IN_P, H1_P), np.float32)
    for c in range(C1_OUT):
        for t in range(L1):
            a1[S1 * t:S1 * t + K1, c * L1 + t] = w1[c, 0, :]

    # conv2 -> A2[c1*L1+t+k, c2*L2+t] = w2[c2, c1, k]
    a2 = np.zeros((H1_P, H2_P), np.float32)
    for c2 in range(C2_OUT):
        for c1 in range(C1_OUT):
            for t in range(L2):
                a2[c1 * L1 + t:c1 * L1 + t + K2, c2 * L2 + t] = w2[c2, c1, :]

    b1p = np.zeros((1, H1_P), np.float32)
    b1p[0, :C1_OUT * L1] = np.repeat(b1, L1)

    b2p = np.zeros((1, H2_P), np.float32)
    b2p[0, :FC_IN] = np.repeat(b2, L2)
    b2p[0, FC_IN] = 1.0                 # constant-1 lane => carries the fc bias

    wfcp = np.zeros((1, H2_P), np.float32)
    wfcp[0, :FC_IN] = wfc[0]            # flatten order c2*L2 + t matches torch .view
    wfcp[0, FC_IN] = bfc[0]             # fc bias folded into the bias lane

    return {
        "a1": jnp.asarray(a1, jnp.bfloat16),    # MXU operands in bf16
        "a2": jnp.asarray(a2, jnp.bfloat16),
        "b1": jnp.asarray(b1p, jnp.float32),    # elementwise math stays f32
        "b2": jnp.asarray(b2p, jnp.float32),
        "wfc": jnp.asarray(wfcp, jnp.float32),
    }


# ---- the Pallas kernel: fused conv1+ReLU+conv2+ReLU+fc+sigmoid -------------
def _cnn1d_kernel(x_ref, a1_ref, b1_ref, a2_ref, b2_ref, wfc_ref, o_ref):
    # conv1 as bf16 matmul against its Toeplitz matrix, f32 accumulate
    h1 = jnp.dot(x_ref[...], a1_ref[...], preferred_element_type=jnp.float32)
    h1 = jnp.maximum(h1 + b1_ref[...], 0.0)                        # (TB, 512) f32

    # conv2 as bf16 matmul
    h2 = jnp.dot(h1.astype(jnp.bfloat16), a2_ref[...],
                 preferred_element_type=jnp.float32)
    h2 = jnp.maximum(h2 + b2_ref[...], 0.0)                        # (TB, 256) f32

    # fc (N=1): VPU multiply + cross-lane (XLU) reduce; fc bias rides the
    # constant-1 lane (column FC_IN) built in prepare_params.
    logit = jnp.sum(h2 * wfc_ref[...], axis=-1, keepdims=True)     # (TB, 1)

    # sigmoid: exp + reciprocal both on the EUP slot
    prob = pl.reciprocal(1.0 + jnp.exp(-logit), approx=True)

    # narrow (TB, 1) store: only 4 B/row of HBM writeback (vs. the old 512 B/row
    # broadcast slab).  block last-dim == full array dim, so the spec is legal.
    o_ref[...] = prob


# ---- jitted wrapper: batch tiling + padding --------------------------------
@functools.partial(jax.jit, static_argnames=("max_block_b",))
def cnn1d_forward(x_ncl, prep, *, max_block_b=1024):
    """x_ncl: (B, 1, 53) float32 -> (B, 1) float32 probabilities."""
    B = x_ncl.shape[0]

    # Batch is only padded to a multiple of 8 per tile (no ballooning to a
    # large block multiple).  For large batches force >= 2 grid steps so the
    # "parallel" axis can be sharded across v7x's two TensorCores.
    b_pad8 = _round_up(B, 8)
    n_tiles = max(_cdiv(b_pad8, max_block_b), 2 if b_pad8 >= 256 else 1)
    block_b = _round_up(_cdiv(b_pad8, n_tiles), 8)
    b_pad = n_tiles * block_b

    # single fused pad of the bf16-cast input (no zeros+scatter copy)
    x2d = x_ncl.reshape(B, L_IN).astype(jnp.bfloat16)
    x_pad = jnp.pad(x2d, ((0, b_pad - B), (0, L_IN_P - L_IN)))

    out = pl.pallas_call(
        _cnn1d_kernel,
        out_shape=jax.ShapeDtypeStruct((b_pad, 1), jnp.float32),
        grid=(n_tiles,),
        in_specs=[
            pl.BlockSpec((block_b, L_IN_P), lambda i: (i, 0)),   # x: batch-tiled
            # weights/biases: constant block index -> fetched once, VMEM-resident
            pl.BlockSpec((L_IN_P, H1_P), lambda i: (0, 0)),
            pl.BlockSpec((1, H1_P), lambda i: (0, 0)),
            pl.BlockSpec((H1_P, H2_P), lambda i: (0, 0)),
            pl.BlockSpec((1, H2_P), lambda i: (0, 0)),
            pl.BlockSpec((1, H2_P), lambda i: (0, 0)),
        ],
        out_specs=pl.BlockSpec((block_b, 1), lambda i: (i, 0)),
        compiler_params=pltpu.CompilerParams(
            dimension_semantics=("parallel",),       # megacore split on v7x
            vmem_limit_bytes=32 * 1024 * 1024),      # covers f32 intermediates on v5e too
    )(x_pad, prep["a1"], prep["b1"], prep["a2"], prep["b2"], prep["wfc"])

    return out[:B]                                    # (B, 1); padded rows dropped


# ---- pure-JAX f32 reference (semantics check against torch forward) --------
def cnn1d_reference(x_ncl, params):
    dn = ("NCH", "OIH", "NCH")
    y = jax.lax.conv_general_dilated(x_ncl, params["w1"], (S1,), "VALID",
                                     dimension_numbers=dn)
    y = jnp.maximum(y + params["b1"][None, :, None], 0.0)
    y = jax.lax.conv_general_dilated(y, params["w2"], (1,), "VALID",
                                     dimension_numbers=dn)
    y = jnp.maximum(y + params["b2"][None, :, None], 0.0)
    y = y.reshape(y.shape[0], -1) @ params["wfc"].T + params["bfc"]
    return jax.nn.sigmoid(y)


if __name__ == "__main__":
    key = jax.random.PRNGKey(0)
    k = jax.random.split(key, 8)

    # deterministic synthetic parameters (same shapes as the torch module)
    params = {
        "w1": 0.2 * jax.random.normal(k[0], (C1_OUT, 1, K1), jnp.float32),
        "b1": 0.1 * jax.random.normal(k[1], (C1_OUT,), jnp.float32),
        "w2": 0.2 * jax.random.normal(k[2], (C2_OUT, C1_OUT, K2), jnp.float32),
        "b2": 0.1 * jax.random.normal(k[3], (C2_OUT,), jnp.float32),
        "wfc": 0.1 * jax.random.normal(k[4], (1, FC_IN), jnp.float32),
        "bfc": 0.1 * jax.random.normal(k[5], (1,), jnp.float32),
    }

    B = 8
    x = jax.random.normal(k[6], (B, 1, L_IN), jnp.float32)  # NCL like torch Conv1d

    prep = prepare_params(params)          # one-time Toeplitz/pad construction
    out = jax.block_until_ready(cnn1d_forward(x, prep))

    ref = jax.block_until_ready(cnn1d_reference(x, params))
    # bf16 MXU operands -> slightly looser tolerance than the f32 reference
    np.testing.assert_allclose(np.asarray(out), np.asarray(ref),
                               rtol=2e-2, atol=2e-2)

    print("KERNEL_OK")
</pallas_src>

<mosaic_0001>
module attributes {stable_mosaic.version = 11 : i64} {
  func.func @_cnn1d_kernel(%arg0: i32, %arg1: memref<8x64xbf16, #tpu.memory_space<vmem>>, %arg2: memref<64x512xbf16, #tpu.memory_space<vmem>>, %arg3: memref<1x512xf32, #tpu.memory_space<vmem>>, %arg4: memref<512x256xbf16, #tpu.memory_space<vmem>>, %arg5: memref<1x256xf32, #tpu.memory_space<vmem>>, %arg6: memref<1x256xf32, #tpu.memory_space<vmem>>, %arg7: memref<8x1xf32, #tpu.memory_space<vmem>>) attributes {dimension_semantics = [#tpu.dimension_semantics<parallel>], iteration_bounds = array<i64: 1>, scalar_prefetch = 0 : i64, scratch_operands = 0 : i64, tpu.core_type = #tpu.core_type<tc>, window_params = [{transform_indices = @transform_0, window_bounds = array<i64: 8, 64>}, {pipeline_mode = #tpu.pipeline_mode<synchronous>, transform_indices = @transform_1, window_bounds = array<i64: 64, 512>}, {pipeline_mode = #tpu.pipeline_mode<synchronous>, transform_indices = @transform_2, window_bounds = array<i64: 1, 512>}, {pipeline_mode = #tpu.pipeline_mode<synchronous>, transform_indices = @transform_3, window_bounds = array<i64: 512, 256>}, {pipeline_mode = #tpu.pipeline_mode<synchronous>, transform_indices = @transform_4, window_bounds = array<i64: 1, 256>}, {pipeline_mode = #tpu.pipeline_mode<synchronous>, transform_indices = @transform_5, window_bounds = array<i64: 1, 256>}, {transform_indices = @transform_6, window_bounds = array<i64: 8, 1>}]} {
    %c0 = arith.constant 0 : index
    %c0_0 = arith.constant 0 : index
    %0 = vector.load %arg1[%c0, %c0_0] : memref<8x64xbf16, #tpu.memory_space<vmem>>, vector<8x64xbf16>
    %c0_1 = arith.constant 0 : index
    %c0_2 = arith.constant 0 : index
    %1 = vector.load %arg2[%c0_1, %c0_2] : memref<64x512xbf16, #tpu.memory_space<vmem>>, vector<64x512xbf16>
    %cst = arith.constant dense<0.000000e+00> : vector<8x512xf32>
    %2 = tpu.matmul %0, %1, %cst {dimension_numbers = #tpu.dot_dimension_numbers<[1], [0], [0], [1], [0, 0, 1, 1], [], []>} : vector<8x64xbf16>, vector<64x512xbf16>, vector<8x512xf32> -> vector<8x512xf32>
    %c0_3 = arith.constant 0 : index
    %c0_4 = arith.constant 0 : index
    %3 = vector.load %arg3[%c0_3, %c0_4] : memref<1x512xf32, #tpu.memory_space<vmem>>, vector<1x512xf32>
    %4 = vector.broadcast %3 : vector<1x512xf32> to vector<8x512xf32>
    %5 = arith.addf %2, %4 : vector<8x512xf32>
    %cst_5 = arith.constant 0.000000e+00 : f32
    %6 = vector.broadcast %cst_5 : f32 to vector<8x512xf32>
    %7 = arith.maximumf %5, %6 : vector<8x512xf32>
    %8 = arith.truncf %7 : vector<8x512xf32> to vector<8x512xbf16>
    %c0_6 = arith.constant 0 : index
    %c0_7 = arith.constant 0 : index
    %9 = vector.load %arg4[%c0_6, %c0_7] : memref<512x256xbf16, #tpu.memory_space<vmem>>, vector<512x256xbf16>
    %cst_8 = arith.constant dense<0.000000e+00> : vector<8x256xf32>
    %10 = tpu.matmul %8, %9, %cst_8 {dimension_numbers = #tpu.dot_dimension_numbers<[1], [0], [0], [1], [0, 0, 1, 1], [], []>} : vector<8x512xbf16>, vector<512x256xbf16>, vector<8x256xf32> -> vector<8x256xf32>
    %c0_9 = arith.constant 0 : index
    %c0_10 = arith.constant 0 : index
    %11 = vector.load %arg5[%c0_9, %c0_10] : memref<1x256xf32, #tpu.memory_space<vmem>>, vector<1x256xf32>
    %12 = vector.broadcast %11 : vector<1x256xf32> to vector<8x256xf32>
    %13 = arith.addf %10, %12 : vector<8x256xf32>
    %cst_11 = arith.constant 0.000000e+00 : f32
    %14 = vector.broadcast %cst_11 : f32 to vector<8x256xf32>
    %15 = arith.maximumf %13, %14 : vector<8x256xf32>
    %c0_12 = arith.constant 0 : index
    %c0_13 = arith.constant 0 : index
    %16 = vector.load %arg6[%c0_12, %c0_13] : memref<1x256xf32, #tpu.memory_space<vmem>>, vector<1x256xf32>
    %17 = vector.broadcast %16 : vector<1x256xf32> to vector<8x256xf32>
    %18 = arith.mulf %15, %17 : vector<8x256xf32>
    %cst_14 = arith.constant dense<0.000000e+00> : vector<8xf32>
    %19 = vector.multi_reduction <add>, %18, %cst_14 [1] : vector<8x256xf32> to vector<8xf32>
    %20 = vector.shape_cast %19 : vector<8xf32> to vector<8x1xf32>
    %cst_15 = arith.constant 0.000000e+00 : f32
    %21 = vector.broadcast %cst_15 : f32 to vector<8x1xf32>
    %22 = arith.subf %21, %20 : vector<8x1xf32>
    %23 = math.exp %22 : vector<8x1xf32>
    %cst_16 = arith.constant 1.000000e+00 : f32
    %24 = vector.broadcast %cst_16 : f32 to vector<8x1xf32>
    %25 = arith.addf %24, %23 : vector<8x1xf32>
    %26 = tpu.reciprocal %25 {approx = true} : vector<8x1xf32> -> vector<8x1xf32>
    %c0_17 = arith.constant 0 : index
    %c0_18 = arith.constant 0 : index
    %27 = vector.load %arg7[%c0_17, %c0_18] : memref<8x1xf32, #tpu.memory_space<vmem>>, vector<8x1xf32>
    tpu.vector_store %arg7[%c0_17, %c0_18], %26 {strides = array<i32>} : memref<8x1xf32, #tpu.memory_space<vmem>>, vector<8x1xf32>,
    return
  }
  func.func @transform_0(%arg0: i32) -> (i32, i32) {
    %c0_i32 = arith.constant 0 : i32
    %c0_i32_0 = arith.constant 0 : i32
    return %arg0, %c0_i32 : i32, i32
  }
  func.func @transform_1(%arg0: i32) -> (i32, i32) {
    %c0_i32 = arith.constant 0 : i32
    %c0_i32_0 = arith.constant 0 : i32
    %c0_i32_1 = arith.constant 0 : i32
    return %c0_i32, %c0_i32_0 : i32, i32
  }
  func.func @transform_2(%arg0: i32) -> (i32, i32) {
    %c0_i32 = arith.constant 0 : i32
    %c0_i32_0 = arith.constant 0 : i32
    %c0_i32_1 = arith.constant 0 : i32
    return %c0_i32, %c0_i32_0 : i32, i32
  }
  func.func @transform_3(%arg0: i32) -> (i32, i32) {
    %c0_i32 = arith.constant 0 : i32
    %c0_i32_0 = arith.constant 0 : i32
    %c0_i32_1 = arith.constant 0 : i32
    return %c0_i32, %c0_i32_0 : i32, i32
  }
  func.func @transform_4(%arg0: i32) -> (i32, i32) {
    %c0_i32 = arith.constant 0 : i32
    %c0_i32_0 = arith.constant 0 : i32
    %c0_i32_1 = arith.constant 0 : i32
    return %c0_i32, %c0_i32_0 : i32, i32
  }
  func.func @transform_5(%arg0: i32) -> (i32, i32) {
    %c0_i32 = arith.constant 0 : i32
    %c0_i32_0 = arith.constant 0 : i32
    %c0_i32_1 = arith.constant 0 : i32
    return %c0_i32, %c0_i32_0 : i32, i32
  }
  func.func @transform_6(%arg0: i32) -> (i32, i32) {
    %c0_i32 = arith.constant 0 : i32
    %c0_i32_0 = arith.constant 0 : i32
    return %arg0, %c0_i32 : i32, i32
  }
}

</mosaic_0001>

<bundles_post_ra>
// kernel: cnn1d_forward.1
= control target key start
LH: loop header
LB: loop body
LE: loop exit
PB: predicated region body
PF: predicated region fallthrough
CT: control target
= control target key end

     0   :  { %11 = vsyncpa [#allocation3], 0  ;;  %s1279_s0 = inlined_call_operand.vmem [shape: bf16[8,64], index: 0, kind: input, shape index: {}]   ;;  %s1280_s1 = inlined_call_operand.hbm [shape: bf16[64,512], index: 1, kind: input, shape index: {}]   ;;  %s1281_s2 = inlined_call_operand.vmem [shape: f32[1,512], index: 2, kind: input, shape index: {}]   ;;  %s1282_s3 = inlined_call_operand.hbm [shape: bf16[512,256], index: 3, kind: input, shape index: {}]   ;;  %s1283_s4 = inlined_call_operand.vmem [shape: f32[1,256], index: 4, kind: input, shape index: {}]   ;;  %s1284_s5 = inlined_call_operand.vmem [shape: f32[1,256], index: 5, kind: input, shape index: {}]   ;;  %s1285_s6 = inlined_call_operand.vmem [shape: f32[8,1], index: 6, kind: output, shape index: {}]  }
   0x1   :  { %s19_s23 = sshll.u32 %s1280_s1, 4  ;;  %s20_s23 = int_to_ptr.hbm [resolvable:$true] %s19_s23 }
   0x2   :  { %12 = vsyncpa [#allocation5], 0  ;;  %s1213_s24 = smov [#allocation2]   ;;  %s34_s28 = sshll.u32 %s1282_s3, 4  ;;  %s35_s28 = int_to_ptr.hbm [resolvable:$true] %s34_s28 }
   0x3   :  { %s21_s25 = sshll.u32 %s1213_s24, 4  ;;  %s1214_s29 = smov 256   ;;  %s22_s25 = int_to_ptr.vmem [resolvable:$true] %s21_s25 }
   0x4   :  { %s1215_s30 = smov 16   ;;  %s1216_s7 = smov [#allocation4]  }
   0x5   :  { %27 = dma.hbm_to_vmem [thread:$0]  %s20_s23, 2048, %s22_s25, [#allocation3], %s1214_s29, %s1214_s29, %s1215_s30  }
   0x6   :  { %s36_s8 = sshll.u32 %s1216_s7, 4  ;;  %s1217_s9 = smov 128   ;;  %s37_s8 = int_to_ptr.vmem [resolvable:$true] %s36_s8 }
   0x7   :  { %s1218_s10 = smov 8  }
   0x8   :  { %42 = dma.hbm_to_vmem [thread:$0]  %s35_s28, 8192, %s37_s8, [#allocation5], %s1217_s9, %s1217_s9, %s1218_s10  }
   0x9   :  { %1209 = dma.done.wait [#allocation3], 2048  }
   0xa   :  { %1210 = vsyncadd [#allocation3], 4294965248 }
   0xb   :  { %1211 = dma.done.wait [#allocation5], 8192  }
   0xc   :  { %1212 = vsyncadd [#allocation5], 4294959104  ;;  %v797_v0 = vld [vmem:[#allocation2 + $0x60] sm:$0xf]  ;;  %v1085_v1 = vld [vmem:[#allocation2 + $0x6c] sm:$0xf0] }
   0xd   :  { %v1083_v2 = vld [vmem:[#allocation2 + $0x64] sm:$0xf]  ;;  %v798_v3 = vor.u32 %v1085_v1, %v797_v0  ;;  %v799_v4 = vld [vmem:[#allocation2 + $0x70] sm:$0xf0]  ;;  %v805_v5 = vld [vmem:[#allocation2 + $0x68] sm:$0xf] }
   0xe   :  { %v1086_v6 = vld [vmem:[#allocation2 + $0x74] sm:$0xf0]  ;;  %v802_v7 = vor.u32 %v1083_v2, %v799_v4  ;;  %v1084_v9 = vld [vmem:[#allocation2 + $0x6c] sm:$0xf]  ;;  %v807_v10 = vld [vmem:[#allocation2 + $0x78] sm:$0xf0] }
   0xf   :  { %v806_v8 = vor.u32 %v1086_v6, %v805_v5  ;;  %v781_v11 = vld [vmem:[#allocation2 + $0x40] sm:$0xf]  ;;  %171 = vmatpush.bf16.msra.mxu0 %v798_v3  ;;  %v810_v12 = vor.u32 %v1084_v9, %v807_v10  ;;  %v1081_v13 = vld [vmem:[#allocation2 + $0x4c] sm:$0xf0]  ;;  %v1079_v14 = vld [vmem:[#allocation2 + $0x44] sm:$0xf] }
  0x10   :  { %v783_v15 = vld [vmem:[#allocation2 + $0x50] sm:$0xf0]  ;;  %184 = vmatpush.bf16.msra.mxu1 %v802_v7  ;;  %v782_v16 = vor.u32 %v1081_v13, %v781_v11  ;;  %v789_v18 = vld [vmem:[#allocation2 + $0x48] sm:$0xf]  ;;  %v1082_v19 = vld [vmem:[#allocation2 + $0x54] sm:$0xf0] }
  0x11   :  { %197 = vmatpush.bf16.msra.mxu2 %v806_v8  ;;  %v786_v17 = vor.u32 %v1079_v14, %v783_v15  ;;  %v1080_v20 = vld [vmem:[#allocation2 + $0x4c] sm:$0xf]  ;;  %210 = vmatpush.bf16.msra.mxu3 %v810_v12  ;;  %v790_v21 = vor.u32 %v1082_v19, %v789_v18  ;;  %v791_v22 = vld [vmem:[#allocation2 + $0x58] sm:$0xf0]  ;;  %v765_v23 = vld [vmem:[#allocation2 + $0x20] sm:$0xf] }
  0x12   :  { %v1077_v24 = vld [vmem:[#allocation2 + $0x2c] sm:$0xf0]  ;;  %v794_v25 = vor.u32 %v1080_v20, %v791_v22  ;;  %v1075_v26 = vld [vmem:[#allocation2 + $0x24] sm:$0xf]  ;;  %v767_v27 = vld [vmem:[#allocation2 + $0x30] sm:$0xf0] }
  0x13   :  { %v773_v28 = vld [vmem:[#allocation2 + $0x28] sm:$0xf]  ;;  %172 = vmatpush.bf16.msra.mxu0 %v782_v16  ;;  %v766_v29 = vor.u32 %v1077_v24, %v765_v23  ;;  %v1078_v30 = vld [vmem:[#allocation2 + $0x34] sm:$0xf0]  ;;  %v1076_v31 = vld [vmem:[#allocation2 + $0x2c] sm:$0xf]  ;;  %v770_v33 = vor.u32 %v1075_v26, %v767_v27 }
  0x14   :  { %v775_v32 = vld [vmem:[#allocation2 + $0x38] sm:$0xf0]  ;;  %185 = vmatpush.bf16.msra.mxu1 %v786_v17  ;;  %v774_v34 = vor.u32 %v1078_v30, %v773_v28  ;;  %v749_v35 = vld [vmem:[#allocation2] sm:$0xf]  ;;  %v1073_v36 = vld [vmem:[#allocation2 + $0xc] sm:$0xf0] }
  0x15   :  { %198 = vmatpush.bf16.msra.mxu2 %v790_v21  ;;  %v1071_v37 = vld [vmem:[#allocation2 + $0x4] sm:$0xf]  ;;  %211 = vmatpush.bf16.msra.mxu3 %v794_v25  ;;  %v778_v38 = vor.u32 %v1076_v31, %v775_v32  ;;  %v751_v39 = vld [vmem:[#allocation2 + $0x10] sm:$0xf0]  ;;  %v757_v40 = vld [vmem:[#allocation2 + $0x8] sm:$0xf]  ;;  %v750_v44 = vor.u32 %v1073_v36, %v749_v35 }
  0x16   :  { %v1074_v41 = vld [vmem:[#allocation2 + $0x14] sm:$0xf0]  ;;  %v1072_v42 = vld [vmem:[#allocation2 + $0xc] sm:$0xf]  ;;  %v759_v43 = vld [vmem:[#allocation2 + $0x18] sm:$0xf0]  ;;  %v754_v48 = vor.u32 %v1071_v37, %v751_v39 }
  0x17   :  { %173 = vmatpush.bf16.msra.mxu0 %v766_v29  ;;  %v873_v45 = vld [vmem:[#allocation4 + $0x70] sm:$0xf]  ;;  %v1102_v46 = vld [vmem:[#allocation4 + $0x74] sm:$0xf0]  ;;  %v758_v49 = vor.u32 %v1074_v41, %v757_v40  ;;  %vm163_vm0 = vcmask 523264   ;;  %v762_v51 = vor.u32 %v1072_v42, %v759_v43  ;;  %vm739_vm1 = vcmask 7168  }
  0x18   :  { %v937_v47 = vld [vmem:[#allocation4 + $0xf0] sm:$0xf]  ;;  %186 = vmatpush.bf16.msra.mxu1 %v770_v33  ;;  %v1118_v50 = vld [vmem:[#allocation4 + $0xf4] sm:$0xf0]  ;;  %v874_v52 = vor.u32 %v1102_v46, %v873_v45  ;;  %v865_v53 = vld [vmem:[#allocation4 + $0x60] sm:$0xf] }
  0x19   :  { %199 = vmatpush.bf16.msra.mxu2 %v774_v34  ;;  %212 = vmatpush.bf16.msra.mxu3 %v778_v38  ;;  %v1100_v54 = vld [vmem:[#allocation4 + $0x64] sm:$0xf0]  ;;  %v1001_v55 = vld [vmem:[#allocation4 + $0x170] sm:$0xf]  ;;  %v938_v56 = vor.u32 %v1118_v50, %v937_v47  ;;  %v1134_v57 = vld [vmem:[#allocation4 + $0x174] sm:$0xf0] }
  0x1a   :  { %v1065_v58 = vld [vmem:[#allocation4 + $0x1f0] sm:$0xf]  ;;  %v1150_v59 = vld [vmem:[#allocation4 + $0x1f4] sm:$0xf0]  ;;  %v56_v60 = vld [vmem:[%s1279_s0] sm:$0xf]  ;;  %v1002_v63 = vor.u32 %v1134_v57, %v1001_v55  ;;  %v866_v0 = vor.u32 %v1100_v54, %v865_v53 }
  0x1b   :  { %174 = vmatpush.bf16.msra.mxu0 %v750_v44  ;;  %v929_v61 = vld [vmem:[#allocation4 + $0xe0] sm:$0xf]  ;;  %v1116_v62 = vld [vmem:[#allocation4 + $0xe4] sm:$0xf0]  ;;  %v1066_v1 = vor.u32 %v1150_v59, %v1065_v58  ;;  %v857_v2 = vld [vmem:[#allocation4 + $0x50] sm:$0xf] }
  0x1c   :  { %187 = vmatpush.bf16.msra.mxu1 %v754_v48  ;;  %v993_v3 = vld [vmem:[#allocation4 + $0x160] sm:$0xf]  ;;  %v1132_v4 = vld [vmem:[#allocation4 + $0x164] sm:$0xf0]  ;;  %v930_v5 = vor.u32 %v1116_v62, %v929_v61  ;;  %v1098_v6 = vld [vmem:[#allocation4 + $0x54] sm:$0xf0] }
  0x1d   :  { %200 = vmatpush.bf16.msra.mxu2 %v758_v49  ;;  %213 = vmatpush.bf16.msra.mxu3 %v762_v51  ;;  %v1057_v7 = vld [vmem:[#allocation4 + $0x1e0] sm:$0xf]  ;;  %v1148_v8 = vld [vmem:[#allocation4 + $0x1e4] sm:$0xf0]  ;;  %v921_v9 = vld [vmem:[#allocation4 + $0xd0] sm:$0xf]  ;;  %v994_v11 = vor.u32 %v1132_v4, %v993_v3  ;;  %v858_v12 = vor.u32 %v1098_v6, %v857_v2 }
  0x1e   :  { %811 = vmatmul.msk.bf16.vlgmr.msra.gmra.mxu0 %vm163_vm0, %v56_v60  ;;  %v1114_v10 = vld [vmem:[#allocation4 + $0xd4] sm:$0xf0]  ;;  %v1058_v13 = vor.u32 %v1148_v8, %v1057_v7  ;;  %v849_v14 = vld [vmem:[#allocation4 + $0x40] sm:$0xf]  ;;  %v985_v15 = vld [vmem:[#allocation4 + $0x150] sm:$0xf] }
  0x1f   :  { %617 = vmatpush.bf16.msrb.mxu0 %v874_v52  ;;  %812 = vmatmul.msk.bf16.vlgmr.msra.gmra.mxu1 %vm163_vm0, %v56_v60  ;;  %v1130_v16 = vld [vmem:[#allocation4 + $0x154] sm:$0xf0]  ;;  %v922_v17 = vor.u32 %v1114_v10, %v921_v9  ;;  %v1096_v18 = vld [vmem:[#allocation4 + $0x44] sm:$0xf0]  ;;  %v1049_v19 = vld [vmem:[#allocation4 + $0x1d0] sm:$0xf] }
  0x20   :  { %630 = vmatpush.bf16.msrb.mxu1 %v938_v56  ;;  %813 = vmatmul.msk.bf16.vlgmr.msra.gmra.mxu2 %vm163_vm0, %v56_v60  ;;  %v1146_v20 = vld [vmem:[#allocation4 + $0x1d4] sm:$0xf0]  ;;  %v913_v21 = vld [vmem:[#allocation4 + $0xc0] sm:$0xf]  ;;  %v1112_v22 = vld [vmem:[#allocation4 + $0xc4] sm:$0xf0]  ;;  %v986_v23 = vor.u32 %v1130_v16, %v985_v15  ;;  %v850_v24 = vor.u32 %v1096_v18, %v849_v14 }
  0x21   :  { %814 = vmatmul.msk.bf16.vlgmr.msra.gmra.mxu3 %vm163_vm0, %v56_v60  ;;  %643 = vmatpush.bf16.msrb.mxu2 %v1002_v63  ;;  %v1050_v25 = vor.u32 %v1146_v20, %v1049_v19  ;;  %v841_v26 = vld [vmem:[#allocation4 + $0x30] sm:$0xf]  ;;  %v977_v27 = vld [vmem:[#allocation4 + $0x140] sm:$0xf]  ;;  %v1128_v28 = vld [vmem:[#allocation4 + $0x144] sm:$0xf0]  ;;  %v914_v29 = vor.u32 %v1112_v22, %v913_v21 }
  0x22   :  { %656 = vmatpush.bf16.msrb.mxu3 %v1066_v1  ;;  %v1094_v30 = vld [vmem:[#allocation4 + $0x34] sm:$0xf0]  ;;  %v1041_v31 = vld [vmem:[#allocation4 + $0x1c0] sm:$0xf]  ;;  %v1144_v32 = vld [vmem:[#allocation4 + $0x1c4] sm:$0xf0]  ;;  %v978_v35 = vor.u32 %v1128_v28, %v977_v27 }
  0x23   :  { %618 = vmatpush.bf16.msrb.mxu0 %v866_v0  ;;  %v905_v33 = vld [vmem:[#allocation4 + $0xb0] sm:$0xf]  ;;  %v1110_v34 = vld [vmem:[#allocation4 + $0xb4] sm:$0xf0]  ;;  %v842_v36 = vor.u32 %v1094_v30, %v841_v26  ;;  %v1042_v37 = vor.u32 %v1144_v32, %v1041_v31  ;;  %v833_v38 = vld [vmem:[#allocation4 + $0x20] sm:$0xf] }
  0x24   :  { %631 = vmatpush.bf16.msrb.mxu1 %v930_v5  ;;  %v969_v39 = vld [vmem:[#allocation4 + $0x130] sm:$0xf]  ;;  %v1126_v40 = vld [vmem:[#allocation4 + $0x134] sm:$0xf0]  ;;  %v906_v41 = vor.u32 %v1110_v34, %v905_v33  ;;  %v1092_v42 = vld [vmem:[#allocation4 + $0x24] sm:$0xf0] }
  0x25   :  { %644 = vmatpush.bf16.msrb.mxu2 %v994_v11  ;;  %v1033_v43 = vld [vmem:[#allocation4 + $0x1b0] sm:$0xf]  ;;  %v1142_v44 = vld [vmem:[#allocation4 + $0x1b4] sm:$0xf0]  ;;  %v897_v45 = vld [vmem:[#allocation4 + $0xa0] sm:$0xf]  ;;  %v970_v47 = vor.u32 %v1126_v40, %v969_v39  ;;  %v834_v48 = vor.u32 %v1092_v42, %v833_v38 }
  0x26   :  { %657 = vmatpush.bf16.msrb.mxu3 %v1058_v13  ;;  %v1108_v46 = vld [vmem:[#allocation4 + $0xa4] sm:$0xf0]  ;;  %v1034_v49 = vor.u32 %v1142_v44, %v1033_v43  ;;  %v825_v50 = vld [vmem:[#allocation4 + $0x10] sm:$0xf]  ;;  %v961_v51 = vld [vmem:[#allocation4 + $0x120] sm:$0xf] }
  0x27   :  { %619 = vmatpush.bf16.msrb.mxu0 %v858_v12  ;;  %v1124_v52 = vld [vmem:[#allocation4 + $0x124] sm:$0xf0]  ;;  %v898_v53 = vor.u32 %v1108_v46, %v897_v45  ;;  %v1090_v54 = vld [vmem:[#allocation4 + $0x14] sm:$0xf0]  ;;  %v1025_v55 = vld [vmem:[#allocation4 + $0x1a0] sm:$0xf] }
  0x28   :  { %632 = vmatpush.bf16.msrb.mxu1 %v922_v17  ;;  %v1140_v56 = vld [vmem:[#allocation4 + $0x1a4] sm:$0xf0]  ;;  %v889_v57 = vld [vmem:[#allocation4 + $0x90] sm:$0xf]  ;;  %v1106_v58 = vld [vmem:[#allocation4 + $0x94] sm:$0xf0]  ;;  %v962_v59 = vor.u32 %v1124_v52, %v961_v51  ;;  %v826_v61 = vor.u32 %v1090_v54, %v825_v50 }
  0x29   :  { %645 = vmatpush.bf16.msrb.mxu2 %v986_v23  ;;  %v817_v60 = vld [vmem:[#allocation4] sm:$0xf]  ;;  %v1026_v62 = vor.u32 %v1140_v56, %v1025_v55  ;;  %v1088_v63 = vld [vmem:[#allocation4 + $0x4] sm:$0xf0]  ;;  %v953_v0 = vld [vmem:[#allocation4 + $0x110] sm:$0xf]  ;;  %v890_v2 = vor.u32 %v1106_v58, %v889_v57 }
  0x2a   :  { %658 = vmatpush.bf16.msrb.mxu3 %v1050_v25  ;;  %v1122_v1 = vld [vmem:[#allocation4 + $0x114] sm:$0xf0]  ;;  %v881_v3 = vld [vmem:[#allocation4 + $0x80] sm:$0xf]  ;;  %v1017_v4 = vld [vmem:[#allocation4 + $0x190] sm:$0xf]  ;;  %v818_v12 = vor.u32 %v1088_v63, %v817_v60 }
  0x2b   :  { %620 = vmatpush.bf16.msrb.mxu0 %v850_v24  ;;  %v1138_v5 = vld [vmem:[#allocation4 + $0x194] sm:$0xf0]  ;;  %v1104_v6 = vld [vmem:[#allocation4 + $0x84] sm:$0xf0]  ;;  %v1101_v7 = vld [vmem:[#allocation4 + $0x74] sm:$0xf]  ;;  %v954_v11 = vor.u32 %v1122_v1, %v953_v0 }
  0x2c   :  { %633 = vmatpush.bf16.msrb.mxu1 %v914_v29  ;;  %v875_v8 = vld [vmem:[#allocation4 + $0x78] sm:$0xf0]  ;;  %v1117_v9 = vld [vmem:[#allocation4 + $0xf4] sm:$0xf]  ;;  %v1018_v13 = vor.u32 %v1138_v5, %v1017_v4  ;;  %v1099_v14 = vld [vmem:[#allocation4 + $0x64] sm:$0xf]  ;;  %v882_v18 = vor.u32 %v1104_v6, %v881_v3 }
  0x2d   :  { %646 = vmatpush.bf16.msrb.mxu2 %v978_v35  ;;  %v939_v10 = vld [vmem:[#allocation4 + $0xf8] sm:$0xf0]  ;;  %v945_v15 = vld [vmem:[#allocation4 + $0x100] sm:$0xf]  ;;  %v1120_v16 = vld [vmem:[#allocation4 + $0x104] sm:$0xf0]  ;;  %v878_v19 = vor.u32 %v1101_v7, %v875_v8 }
  0x2e   :  { %659 = vmatpush.bf16.msrb.mxu3 %v1042_v37  ;;  %v1009_v17 = vld [vmem:[#allocation4 + $0x180] sm:$0xf]  ;;  %v1136_v20 = vld [vmem:[#allocation4 + $0x184] sm:$0xf0]  ;;  %v1133_v21 = vld [vmem:[#allocation4 + $0x174] sm:$0xf]  ;;  %v942_v23 = vor.u32 %v1117_v9, %v939_v10  ;;  %v946_v29 = vor.u32 %v1120_v16, %v945_v15 }
  0x2f   :  { %621 = vmatpush.bf16.msrb.mxu0 %v842_v36  ;;  %v1003_v22 = vld [vmem:[#allocation4 + $0x178] sm:$0xf0]  ;;  %v867_v24 = vld [vmem:[#allocation4 + $0x68] sm:$0xf0]  ;;  %v1149_v25 = vld [vmem:[#allocation4 + $0x1f4] sm:$0xf]  ;;  %v1010_v30 = vor.u32 %v1136_v20, %v1009_v17 }
  0x30   :  { %634 = vmatpush.bf16.msrb.mxu1 %v906_v41  ;;  %v1067_v26 = vld [vmem:[#allocation4 + $0x1f8] sm:$0xf0]  ;;  %v1115_v27 = vld [vmem:[#allocation4 + $0xe4] sm:$0xf]  ;;  %v931_v28 = vld [vmem:[#allocation4 + $0xe8] sm:$0xf0]  ;;  %v1006_v31 = vor.u32 %v1133_v21, %v1003_v22  ;;  %v870_v32 = vor.u32 %v1099_v14, %v867_v24 }
  0x31   :  { %647 = vmatpush.bf16.msrb.mxu2 %v970_v47  ;;  %v1070_v33 = vor.u32 %v1149_v25, %v1067_v26  ;;  %v934_v34 = vor.u32 %v1115_v27, %v931_v28  ;;  %v1097_v35 = vld [vmem:[#allocation4 + $0x54] sm:$0xf]  ;;  %v859_v36 = vld [vmem:[#allocation4 + $0x58] sm:$0xf0]  ;;  %v1131_v41 = vld [vmem:[#allocation4 + $0x164] sm:$0xf] }
  0x32   :  { %660 = vmatpush.bf16.msrb.mxu3 %v1034_v49  ;;  %v1113_v37 = vld [vmem:[#allocation4 + $0xd4] sm:$0xf]  ;;  %v862_v38 = vor.u32 %v1097_v35, %v859_v36  ;;  %v923_v39 = vld [vmem:[#allocation4 + $0xd8] sm:$0xf0]  ;;  %v995_v42 = vld [vmem:[#allocation4 + $0x168] sm:$0xf0] }
  0x33   :  { %622 = vmatpush.bf16.msrb.mxu0 %v834_v48  ;;  %v926_v40 = vor.u32 %v1113_v37, %v923_v39  ;;  %v998_v43 = vor.u32 %v1131_v41, %v995_v42  ;;  %v1147_v44 = vld [vmem:[#allocation4 + $0x1e4] sm:$0xf]  ;;  %v1059_v45 = vld [vmem:[#allocation4 + $0x1e8] sm:$0xf0]  ;;  %v987_v54 = vld [vmem:[#allocation4 + $0x158] sm:$0xf0] }
  0x34   :  { %635 = vmatpush.bf16.msrb.mxu1 %v898_v53  ;;  %v1062_v46 = vor.u32 %v1147_v44, %v1059_v45  ;;  %v1095_v47 = vld [vmem:[#allocation4 + $0x44] sm:$0xf]  ;;  %v851_v48 = vld [vmem:[#allocation4 + $0x48] sm:$0xf0]  ;;  %v1129_v53 = vld [vmem:[#allocation4 + $0x154] sm:$0xf] }
  0x35   :  { %648 = vmatpush.bf16.msrb.mxu2 %v962_v59  ;;  %v1111_v49 = vld [vmem:[#allocation4 + $0xc4] sm:$0xf]  ;;  %v854_v50 = vor.u32 %v1095_v47, %v851_v48  ;;  %v915_v51 = vld [vmem:[#allocation4 + $0xc8] sm:$0xf0]  ;;  %v1145_v55 = vld [vmem:[#allocation4 + $0x1d4] sm:$0xf]  ;;  %v990_v56 = vor.u32 %v1129_v53, %v987_v54 }
  0x36   :  { %661 = vmatpush.bf16.msrb.mxu3 %v1026_v62  ;;  %v918_v52 = vor.u32 %v1111_v49, %v915_v51  ;;  %v1051_v57 = vld [vmem:[#allocation4 + $0x1d8] sm:$0xf0]  ;;  %v1093_v59 = vld [vmem:[#allocation4 + $0x34] sm:$0xf]  ;;  %v1127_v1 = vld [vmem:[#allocation4 + $0x144] sm:$0xf] }
  0x37   :  { %623 = vmatpush.bf16.msrb.mxu0 %v826_v61  ;;  %v1054_v58 = vor.u32 %v1145_v55, %v1051_v57  ;;  %v843_v60 = vld [vmem:[#allocation4 + $0x38] sm:$0xf0]  ;;  %v1109_v62 = vld [vmem:[#allocation4 + $0xb4] sm:$0xf]  ;;  %v1143_v3 = vld [vmem:[#allocation4 + $0x1c4] sm:$0xf] }
  0x38   :  { %636 = vmatpush.bf16.msrb.mxu1 %v890_v2  ;;  %v846_v61 = vor.u32 %v1093_v59, %v843_v60  ;;  %v907_v63 = vld [vmem:[#allocation4 + $0xb8] sm:$0xf0]  ;;  %v979_v2 = vld [vmem:[#allocation4 + $0x148] sm:$0xf0]  ;;  %v1091_v7 = vld [vmem:[#allocation4 + $0x24] sm:$0xf] }
  0x39   :  { %649 = vmatpush.bf16.msrb.mxu2 %v954_v11  ;;  %v910_v0 = vor.u32 %v1109_v62, %v907_v63  ;;  %v982_v4 = vor.u32 %v1127_v1, %v979_v2  ;;  %v1043_v5 = vld [vmem:[#allocation4 + $0x1c8] sm:$0xf0]  ;;  %v1107_v9 = vld [vmem:[#allocation4 + $0xa4] sm:$0xf]  ;;  %v971_v14 = vld [vmem:[#allocation4 + $0x138] sm:$0xf0] }
  0x3a   :  { %662 = vmatpush.bf16.msrb.mxu3 %v1018_v13  ;;  %v1046_v6 = vor.u32 %v1143_v3, %v1043_v5  ;;  %v835_v8 = vld [vmem:[#allocation4 + $0x28] sm:$0xf0]  ;;  %v1125_v13 = vld [vmem:[#allocation4 + $0x134] sm:$0xf]  ;;  %v1035_v17 = vld [vmem:[#allocation4 + $0x1b8] sm:$0xf0] }
  0x3b   :  { %624 = vmatpush.bf16.msrb.mxu0 %v818_v12  ;;  %v838_v10 = vor.u32 %v1091_v7, %v835_v8  ;;  %v899_v11 = vld [vmem:[#allocation4 + $0xa8] sm:$0xf0]  ;;  %v1141_v15 = vld [vmem:[#allocation4 + $0x1b4] sm:$0xf]  ;;  %v974_v16 = vor.u32 %v1125_v13, %v971_v14  ;;  %v827_v20 = vld [vmem:[#allocation4 + $0x18] sm:$0xf0] }
  0x3c   :  { %637 = vmatpush.bf16.msrb.mxu1 %v882_v18  ;;  %v902_v12 = vor.u32 %v1107_v9, %v899_v11  ;;  %v1038_v18 = vor.u32 %v1141_v15, %v1035_v17  ;;  %v1105_v21 = vld [vmem:[#allocation4 + $0x94] sm:$0xf]  ;;  %v1123_v24 = vld [vmem:[#allocation4 + $0x124] sm:$0xf]  ;;  %v963_v25 = vld [vmem:[#allocation4 + $0x128] sm:$0xf0] }
  0x3d   :  { %650 = vmatpush.bf16.msrb.mxu2 %v946_v29  ;;  %v966_v27 = vor.u32 %v1123_v24, %v963_v25  ;;  %v1139_v28 = vld [vmem:[#allocation4 + $0x1a4] sm:$0xf]  ;;  %v1027_v29 = vld [vmem:[#allocation4 + $0x1a8] sm:$0xf0]  ;;  %v1121_v37 = vld [vmem:[#allocation4 + $0x114] sm:$0xf] }
  0x3e   :  { %663 = vmatpush.bf16.msrb.mxu3 %v1010_v30  ;;  %v1087_v30 = vld [vmem:[#allocation4 + $0x4] sm:$0xf]  ;;  %v1137_v39 = vld [vmem:[#allocation4 + $0x194] sm:$0xf]  ;;  %v1019_v41 = vld [vmem:[#allocation4 + $0x198] sm:$0xf0] }
  0x3f   :  { %669 = vmatpush.bf16.msra.mxu0 %v878_v19  ;;  %v1089_v19 = vld [vmem:[#allocation4 + $0x14] sm:$0xf]  ;;  %v1022_v42 = vor.u32 %v1137_v39, %v1019_v41  ;;  %v947_v44 = vld [vmem:[#allocation4 + $0x108] sm:$0xf0]  ;;  %v1135_v45 = vld [vmem:[#allocation4 + $0x184] sm:$0xf] }
  0x40   :  { %682 = vmatpush.bf16.msra.mxu1 %v942_v23  ;;  %v830_v22 = vor.u32 %v1089_v19, %v827_v20  ;;  %v891_v23 = vld [vmem:[#allocation4 + $0x98] sm:$0xf0]  ;;  %v1011_v47 = vld [vmem:[#allocation4 + $0x188] sm:$0xf0]  ;;  %v73_v48 = vld [vmem:[%s1281_s2] sm:$0xf] }
  0x41   :  { %695 = vmatpush.bf16.msra.mxu2 %v1006_v31  ;;  %v894_v26 = vor.u32 %v1105_v21, %v891_v23  ;;  %v1030_v31 = vor.u32 %v1139_v28, %v1027_v29  ;;  %v1014_v49 = vor.u32 %v1135_v45, %v1011_v47  ;;  %v76_v51 = vperm.slane %v73_v48, 1  ;;  %v291_v13 = vld [vmem:[%s1283_s4] sm:$0x3] }
  0x42   :  { %708 = vmatpush.bf16.msra.mxu3 %v1070_v33  ;;  %v1103_v33 = vld [vmem:[#allocation4 + $0x84] sm:$0xf]  ;;  %v78_v60 = vperm.slane %v73_v48, 3  ;;  %v293_v15 = vperm.slane %v291_v13, 0 }
  0x43   :  { %670 = vmatpush.bf16.msra.mxu0 %v870_v32  ;;  %v819_v32 = vld [vmem:[#allocation4 + $0x8] sm:$0xf0] }
  0x44   :  { %683 = vmatpush.bf16.msra.mxu1 %v934_v34  ;;  %v883_v34 = vld [vmem:[#allocation4 + $0x88] sm:$0xf0]  ;;  %v822_v35 = vor.u32 %v1087_v30, %v819_v32  ;;  %v723_v32 = vld [vmem:[%s1284_s5] sm:$0x3] }
  0x45   :  { %696 = vmatpush.bf16.msra.mxu2 %v998_v43  ;;  %v886_v36 = vor.u32 %v1103_v33, %v883_v34  ;;  %v1119_v43 = vld [vmem:[#allocation4 + $0x104] sm:$0xf] }
  0x46   :  { %709 = vmatpush.bf16.msra.mxu3 %v1062_v46  ;;  %v950_v46 = vor.u32 %v1119_v43, %v947_v44 }
  0x47   :  { %671 = vmatpush.bf16.msra.mxu0 %v862_v38  ;;  %v955_v38 = vld [vmem:[#allocation4 + $0x118] sm:$0xf0] }
  0x48   :  { %684 = vmatpush.bf16.msra.mxu1 %v926_v40  ;;  %v958_v40 = vor.u32 %v1121_v37, %v955_v38  ;;  %v725_v37 = vperm.slane %v723_v32, 0  ;;  %v726_v38 = vperm.slane %v723_v32, 1 }
  0x49   :  { %697 = vmatpush.bf16.msra.mxu2 %v990_v56 }
  0x4a   :  { %710 = vmatpush.bf16.msra.mxu3 %v1054_v58  ;;  %v77_v58 = vperm.slane %v73_v48, 2 }
  0x4b   :  { %672 = vmatpush.bf16.msra.mxu0 %v854_v50  ;;  %v75_v50 = vperm.slane %v73_v48, 0 }
  0x4c   :  { %685 = vmatpush.bf16.msra.mxu1 %v918_v52 }
  0x4d   :  { %698 = vmatpush.bf16.msra.mxu2 %v982_v4 }
  0x4e   :  { %711 = vmatpush.bf16.msra.mxu3 %v1046_v6 }
  0x4f   :  { %673 = vmatpush.bf16.msra.mxu0 %v846_v61 }
  0x50   :  { %686 = vmatpush.bf16.msra.mxu1 %v910_v0 }
  0x51   :  { %699 = vmatpush.bf16.msra.mxu2 %v974_v16 }
  0x52   :  { %712 = vmatpush.bf16.msra.mxu3 %v1038_v18 }
  0x53   :  { %674 = vmatpush.bf16.msra.mxu0 %v838_v10 }
  0x54   :  { %687 = vmatpush.bf16.msra.mxu1 %v902_v12 }
  0x55   :  { %700 = vmatpush.bf16.msra.mxu2 %v966_v27 }
  0x56   :  { %713 = vmatpush.bf16.msra.mxu3 %v1030_v31 }
  0x57   :  { %675 = vmatpush.bf16.msra.mxu0 %v830_v22  ;;  %v294_v22 = vperm.slane %v291_v13, 1 }
  0x58   :  { %688 = vmatpush.bf16.msra.mxu1 %v894_v26 }
  0x59   :  { %701 = vmatpush.bf16.msra.mxu2 %v958_v40 }
  0x5a   :  { %714 = vmatpush.bf16.msra.mxu3 %v1022_v42 }
  0x5b   :  { %676 = vmatpush.bf16.msra.mxu0 %v822_v35 }
  0x5c   :  { %689 = vmatpush.bf16.msra.mxu1 %v886_v36 }
  0x5d   :  { %702 = vmatpush.bf16.msra.mxu2 %v950_v46 }
  0x5e   :  { %715 = vmatpush.bf16.msra.mxu3 %v1014_v49 }
  0x9b   :  { %v176_v52 = vpop.f32.mrf.mxu0 }
  0x9c   :  { %v177_v53 = vadd.f32 %v176_v52, %v75_v50  ;;  %v189_v54 = vpop.f32.mrf.mxu1 }
  0x9d   :  { %v190_v55 = vadd.f32 %v189_v54, %v76_v51 }
  0x9e   :  { %v219_v56 = vmax.f32 %v177_v53, 0.0 }
  0x9f   :  { %v220_v57 = vmax.f32 %v190_v55, 0.0 }
  0xa0   :  { %v223_v59 = vpack.c.bf16 %v219_v56, %v219_v56 }
  0xa1   :  { %v224_v61 = vpack.c.bf16 %v220_v57, %v220_v57 }
  0xa2   :  { %625 = vmatmul.bf16.vlgmr.msrb.gmra.mxu0 %v223_v59 }
  0xa3   :  { %v202_v62 = vpop.f32.mrf.mxu2  ;;  %638 = vmatmul.bf16.vlgmr.msrb.gmra.mxu1 %v224_v61  ;;  %v178_v1 = vpop.f32.mrf.mxu0 }
  0xa4   :  { %v203_v63 = vadd.f32 %v202_v62, %v77_v58  ;;  %v215_v0 = vpop.f32.mrf.mxu3  ;;  %v191_v3 = vpop.f32.mrf.mxu1 }
  0xa5   :  { %v216_v2 = vadd.f32 %v215_v0, %v78_v60 }
  0xa6   :  { %v221_v4 = vmax.f32 %v203_v63, 0.0 }
  0xa7   :  { %v222_v5 = vmax.f32 %v216_v2, 0.0 }
  0xa8   :  { %v225_v6 = vpack.c.bf16 %v221_v4, %v221_v4 }
  0xa9   :  { %v226_v7 = vpack.c.bf16 %v222_v5, %v222_v5 }
  0xaa   :  { %651 = vmatmul.bf16.vlgmr.msrb.gmra.mxu2 %v225_v6 }
  0xab   :  { %664 = vmatmul.bf16.vlgmr.msrb.gmra.mxu3 %v226_v7  ;;  %v204_v8 = vpop.f32.mrf.mxu2 }
  0xac   :  { %v217_v9 = vpop.f32.mrf.mxu3 }
  0xb2   :  { %677 = vmatmul.bf16.vlgmr.msra.gmra.mxu0 %v223_v59 }
  0xb3   :  { %690 = vmatmul.bf16.vlgmr.msra.gmra.mxu1 %v224_v61 }
  0xba   :  { %703 = vmatmul.bf16.vlgmr.msra.gmra.mxu2 %v225_v6 }
  0xbb   :  { %716 = vmatmul.bf16.vlgmr.msra.gmra.mxu3 %v226_v7 }
 0x11f   :  { %v626_v10 = vpop.f32.mrf.mxu0 }
 0x120   :  { %v639_v11 = vpop.f32.mrf.mxu1  ;;  %v627_v18 = vadd.f32 %v626_v10, %v293_v15 }
 0x122   :  { %v640_v21 = vadd.f32 %v639_v11, %v627_v18 }
 0x127   :  { %v628_v12 = vpop.f32.mrf.mxu0 }
 0x128   :  { %v641_v14 = vpop.f32.mrf.mxu1 }
 0x12d   :  { %v652_v16 = vpop.f32.mrf.mxu2 }
 0x12e   :  { %v665_v17 = vpop.f32.mrf.mxu3  ;;  %v653_v25 = vadd.f32 %v652_v16, %v640_v21 }
 0x12f   :  { %v678_v19 = vpop.f32.mrf.mxu0 }
 0x130   :  { %v691_v20 = vpop.f32.mrf.mxu1  ;;  %v679_v26 = vadd.f32 %v678_v19, %v294_v22  ;;  %v666_v29 = vadd.f32 %v665_v17, %v653_v25 }
 0x132   :  { %v692_v30 = vadd.f32 %v691_v20, %v679_v26  ;;  %v721_v35 = vmax.f32 %v666_v29, 0.0 }
 0x134   :  { %v729_v40 = vmul.f32 %v725_v37, %v721_v35 }
 0x135   :  { %v654_v23 = vpop.f32.mrf.mxu2 }
 0x136   :  { %v667_v24 = vpop.f32.mrf.mxu3 }
 0x137   :  { %v680_v27 = vpop.f32.mrf.mxu0 }
 0x138   :  { %v693_v28 = vpop.f32.mrf.mxu1 }
 0x13d   :  { %v704_v31 = vpop.f32.mrf.mxu2 }
 0x13e   :  { %v705_v33 = vadd.f32 %v704_v31, %v692_v30  ;;  %v717_v34 = vpop.f32.mrf.mxu3 }
 0x140   :  { %v718_v36 = vadd.f32 %v717_v34, %v705_v33 }
 0x142   :  { %v722_v39 = vmax.f32 %v718_v36, 0.0 }
 0x144   :  { %v730_v41 = vmul.f32 %v726_v38, %v722_v39 }
 0x145   :  { %v706_v42 = vpop.f32.mrf.mxu2 }
 0x146   :  { %v719_v43 = vpop.f32.mrf.mxu3  ;;  %v731_v44 = vadd.f32 %v730_v41, %v729_v40 }
 0x148   :  { %732 = vadd.xlane.f32.xlu0 %v731_v44 }
 0x1bb   :  { %v733_v45 = vpop.xlane.xlu0 %732 }
 0x1bc   :  { %v734_v46 = vsub.f32 0.0, %v733_v45 }
 0x1be   :  { %v735_v47 = vmul.f32 1.442695, %v734_v46 }
 0x1c0   :  { %1157 = vpow2.f32 %v735_v47 }
 0x1c6   :  { %v1158_v48 = vpop.eup %1157 }
 0x1c7   :  { %v737_v49 = vadd.f32 1.0, %v1158_v48 }
 0x1c9   :  { %1159 = vrcp.f32 %v737_v49 }
 0x1cf   :  { %v1160_v50 = vpop.eup %1159 }
 0x1d0   :  { %740 = vst.msk [vmem:[%s1285_s6] sm:$0xff] %vm739_vm1, %v1160_v50 }
 0x1d1   :  { %745 = vsyncpa [#allocation3], 1 }
 0x1d2   :  { %746 = vsyncpa [#allocation5], 1 }

</bundles_post_ra>
